<compile_context>
chip_gen: v6e
topology: v6e:2x2x1
jax: 0.10.0
libtpu: 0.0.40
codegen_flags: <defaults>
</compile_context>

<pallas_src>
import functools

import jax
import jax.numpy as jnp
from jax import lax
from jax.experimental import pallas as pl
from jax.experimental.pallas import tpu as pltpu


# ----------------------------------------------------------------------------
# Tile-size helper: largest divisor of `dim` that is <= target, preferring
# 128-aligned tiles (lane-dense stores, well-fed MXU).
# ----------------------------------------------------------------------------
def _pick_tile(dim, target):
    if dim <= target:
        return dim
    best = 1
    for t in range(target, 0, -1):
        if dim % t == 0:
            if t % 128 == 0:
                return t
            if best == 1:
                best = t
    return best


# ----------------------------------------------------------------------------
# Kernel 1: tiled dense / linear layer   y = x @ W + b
#   x: [M, K]   W: [K, N]   b: [1, N]   y: [M, N]
# ----------------------------------------------------------------------------
def _linear_kernel(x_ref, w_ref, b_ref, o_ref, acc_ref):
    k = pl.program_id(2)

    @pl.when(k == 0)
    def _():
        acc_ref[...] = jnp.zeros_like(acc_ref)

    acc_ref[...] += jnp.dot(
        x_ref[...], w_ref[...], preferred_element_type=jnp.float32)

    @pl.when(k == pl.num_programs(2) - 1)
    def _():
        # Bias add only once, in the final K step (epilogue).
        o_ref[...] = (acc_ref[...] + b_ref[...].astype(jnp.float32)).astype(
            o_ref.dtype)


def linear(x, w, b, *, tm_target=256, tn_target=256, tk_target=512):
    m, k_dim = x.shape
    _, n = w.shape
    tm = _pick_tile(m, tm_target)
    tn = _pick_tile(n, tn_target)
    tk = _pick_tile(k_dim, tk_target)
    grid = (m // tm, n // tn, k_dim // tk)
    return pl.pallas_call(
        _linear_kernel,
        out_shape=jax.ShapeDtypeStruct((m, n), x.dtype),
        grid_spec=pltpu.PrefetchScalarGridSpec(
            num_scalar_prefetch=0,
            grid=grid,
            in_specs=[
                pl.BlockSpec((tm, tk), lambda i, j, k: (i, k)),
                pl.BlockSpec((tk, tn), lambda i, j, k: (k, j)),
                pl.BlockSpec((1, tn), lambda i, j, k: (0, j)),
            ],
            out_specs=pl.BlockSpec((tm, tn), lambda i, j, k: (i, j)),
            scratch_shapes=[pltpu.VMEM((tm, tn), jnp.float32)],
        ),
        compiler_params=pltpu.CompilerParams(
            dimension_semantics=("parallel", "parallel", "arbitrary"),
            vmem_limit_bytes=48 * 1024 * 1024,  # fits v7x's 64 MiB physical VMEM
        ),
    )(x, w, b)


# ----------------------------------------------------------------------------
# Kernel 2: per-batch multi-head scaled dot-product attention
#   q, k, v : [B, S, hid]  (heads are lane-contiguous slices of the last dim)
#   outputs : context [B, Sq, hid]  (+ optional attention [B, H, Sq, Sk])
# ----------------------------------------------------------------------------
def _attention_kernel(q_ref, k_ref, v_ref, ctx_ref, *maybe_attn_ref,
                      n_heads, head_dim, scale):
    attn_ref = maybe_attn_ref[0] if maybe_attn_ref else None

    inv_scale = 1.0 / scale
    q = q_ref[0].astype(jnp.float32) * inv_scale   # [Sq, hid], scale folded in
    k = k_ref[0].astype(jnp.float32)               # [Sk, hid]
    v = v_ref[0]                                   # [Sk, hid], keep input dtype

    ctx_parts = []
    for h in range(n_heads):                       # static unrolled loop
        lo = h * head_dim
        qh = q[:, lo:lo + head_dim]
        kh = k[:, lo:lo + head_dim]
        vh = v[:, lo:lo + head_dim]

        # energy = (Q/scale) @ K^T  -- contraction via dot_general, no k.T
        energy = lax.dot_general(
            qh, kh, (((1,), (1,)), ((), ())),
            preferred_element_type=jnp.float32)    # [Sq, Sk]

        # numerically-stable softmax; reciprocal on the (otherwise idle) EUP
        m = jnp.max(energy, axis=-1, keepdims=True)
        e = jnp.exp(energy - m)
        denom = jnp.sum(e, axis=-1, keepdims=True)
        attn = e * pl.reciprocal(denom, approx=True)

        if attn_ref is not None:
            attn_ref[0, h] = attn.astype(attn_ref.dtype)

        # context = attention @ V  (dropout == identity in eval mode);
        # cast attn to the input dtype so bf16 inputs stay on the bf16 MXU path.
        ctx_parts.append(jnp.dot(attn.astype(v_ref.dtype), vh,
                                 preferred_element_type=jnp.float32))

    # One lane-dense store of the merged heads: [Sq, hid]
    ctx_ref[0] = jnp.concatenate(ctx_parts, axis=-1).astype(ctx_ref.dtype)


def scaled_dot_product_attention(q, k, v, n_heads, scale, *,
                                 return_attention=True):
    b, sq, hid = q.shape
    sk = k.shape[1]
    head_dim = hid // n_heads

    kernel = functools.partial(_attention_kernel, n_heads=n_heads,
                               head_dim=head_dim, scale=scale)

    out_shape = [jax.ShapeDtypeStruct((b, sq, hid), q.dtype)]
    out_specs = [pl.BlockSpec((1, sq, hid), lambda i: (i, 0, 0))]
    if return_attention:
        out_shape.append(jax.ShapeDtypeStruct((b, n_heads, sq, sk), q.dtype))
        out_specs.append(pl.BlockSpec((1, n_heads, sq, sk),
                                      lambda i: (i, 0, 0, 0)))

    outs = pl.pallas_call(
        kernel,
        out_shape=tuple(out_shape),
        grid=(b,),
        in_specs=[
            pl.BlockSpec((1, sq, hid), lambda i: (i, 0, 0)),
            pl.BlockSpec((1, sk, hid), lambda i: (i, 0, 0)),
            pl.BlockSpec((1, sk, hid), lambda i: (i, 0, 0)),
        ],
        out_specs=tuple(out_specs),
        compiler_params=pltpu.CompilerParams(
            dimension_semantics=("parallel",),
            vmem_limit_bytes=48 * 1024 * 1024,
        ),
    )(q, k, v)

    if return_attention:
        return outs[0], outs[1]
    return outs[0], None


# ----------------------------------------------------------------------------
# Full module forward (no XLA-level head-split/merge transposes)
# ----------------------------------------------------------------------------
def multi_head_attention_forward(query, key, value, params, n_heads,
                                 *, return_attention=True):
    bsz, q_len, hid_dim = query.shape
    k_len = key.shape[1]
    head_dim = hid_dim // n_heads
    scale = float(head_dim) ** 0.5

    # --- Q / K / V projections (tiled Pallas linear kernels) ---
    Q = linear(query.reshape(bsz * q_len, hid_dim), params["wq"], params["bq"])
    K = linear(key.reshape(bsz * k_len, hid_dim), params["wk"], params["bk"])
    V = linear(value.reshape(bsz * k_len, hid_dim), params["wv"], params["bv"])

    Q = Q.reshape(bsz, q_len, hid_dim)   # free reshapes; heads stay lane-packed
    K = K.reshape(bsz, k_len, hid_dim)
    V = V.reshape(bsz, k_len, hid_dim)

    # --- attention (Pallas kernel, heads sliced inside the kernel) ---
    ctx, attention = scaled_dot_product_attention(
        Q, K, V, n_heads, scale, return_attention=return_attention)

    # --- output projection ---
    x = linear(ctx.reshape(bsz * q_len, hid_dim), params["wo"], params["bo"])
    x = x.reshape(bsz, q_len, hid_dim)
    return x, attention


# ----------------------------------------------------------------------------
# Deterministic parameter initialization (synthetic; not a checkpoint load)
# ----------------------------------------------------------------------------
def init_params(key, hid_dim):
    keys = jax.random.split(key, 8)
    scale = 1.0 / (hid_dim ** 0.5)

    def w(k):
        return (jax.random.uniform(k, (hid_dim, hid_dim), jnp.float32,
                                   minval=-1.0, maxval=1.0) * scale)

    def b(k):
        return (jax.random.uniform(k, (1, hid_dim), jnp.float32,
                                   minval=-1.0, maxval=1.0) * scale)

    return {
        "wq": w(keys[0]), "bq": b(keys[1]),
        "wk": w(keys[2]), "bk": b(keys[3]),
        "wv": w(keys[4]), "bv": b(keys[5]),
        "wo": w(keys[6]), "bo": b(keys[7]),
    }


# ----------------------------------------------------------------------------
# Pure-JAX reference (sanity check of the kernels)
# ----------------------------------------------------------------------------
def reference_forward(query, key, value, params, n_heads):
    bsz, q_len, hid_dim = query.shape
    k_len = key.shape[1]
    head_dim = hid_dim // n_heads
    scale = float(head_dim) ** 0.5

    Q = query @ params["wq"] + params["bq"]
    K = key @ params["wk"] + params["bk"]
    V = value @ params["wv"] + params["bv"]
    Q = Q.reshape(bsz, q_len, n_heads, head_dim).transpose(0, 2, 1, 3)
    K = K.reshape(bsz, k_len, n_heads, head_dim).transpose(0, 2, 1, 3)
    V = V.reshape(bsz, k_len, n_heads, head_dim).transpose(0, 2, 1, 3)
    energy = jnp.einsum("bhqd,bhkd->bhqk", Q, K) / scale
    attn = jax.nn.softmax(energy, axis=-1)
    ctx = jnp.einsum("bhqk,bhkd->bhqd", attn, V)
    x = ctx.transpose(0, 2, 1, 3).reshape(bsz, q_len, hid_dim)
    x = x @ params["wo"] + params["bo"]
    return x, attn


if __name__ == "__main__":
    batch = 2
    seq = 8
    hid_dim = 32
    n_heads = 4

    key0 = jax.random.PRNGKey(0)
    k_p, k_q, k_k, k_v = jax.random.split(key0, 4)

    params = init_params(k_p, hid_dim)
    query = jax.random.normal(k_q, (batch, seq, hid_dim), jnp.float32)
    key_in = jax.random.normal(k_k, (batch, seq, hid_dim), jnp.float32)
    value = jax.random.normal(k_v, (batch, seq, hid_dim), jnp.float32)

    out, attn = multi_head_attention_forward(query, key_in, value, params,
                                             n_heads)
    out = jax.block_until_ready(out)
    attn = jax.block_until_ready(attn)

    ref_out, ref_attn = reference_forward(query, key_in, value, params, n_heads)
    assert out.shape == (batch, seq, hid_dim)
    assert attn.shape == (batch, n_heads, seq, seq)
    # Tolerances account for the approximate EUP reciprocal in the softmax.
    assert jnp.allclose(out, ref_out, atol=5e-3, rtol=5e-3)
    assert jnp.allclose(attn, ref_attn, atol=5e-3, rtol=5e-3)

    print("KERNEL_OK")
</pallas_src>

<mosaic_0001>
module attributes {stable_mosaic.version = 11 : i64} {
  func.func @_linear_kernel(%arg0: i32, %arg1: i32, %arg2: i32, %arg3: memref<16x32xf32, #tpu.memory_space<vmem>>, %arg4: memref<32x32xf32, #tpu.memory_space<vmem>>, %arg5: memref<1x32xf32, #tpu.memory_space<vmem>>, %arg6: memref<16x32xf32, #tpu.memory_space<vmem>>, %arg7: memref<16x32xf32, #tpu.memory_space<vmem>>) attributes {dimension_semantics = [#tpu.dimension_semantics<parallel>, #tpu.dimension_semantics<parallel>, #tpu.dimension_semantics<arbitrary>], iteration_bounds = array<i64: 1, 1, 1>, scalar_prefetch = 0 : i64, scratch_operands = 1 : i64, tpu.core_type = #tpu.core_type<tc>, window_params = [{transform_indices = @transform_0, window_bounds = array<i64: 16, 32>}, {transform_indices = @transform_1, window_bounds = array<i64: 32, 32>}, {transform_indices = @transform_2, window_bounds = array<i64: 1, 32>}, {transform_indices = @transform_3, window_bounds = array<i64: 16, 32>}]} {
    %c0_i32 = arith.constant 0 : i32
    %0 = arith.cmpi eq, %arg2, %c0_i32 : i32
    %1 = arith.extui %0 : i1 to i32
    %c0_i32_0 = arith.constant 0 : i32
    %2 = arith.cmpi ne, %1, %c0_i32_0 : i32
    scf.if %2 {
      %cst_10 = arith.constant 0.000000e+00 : f32
      %12 = vector.broadcast %cst_10 : f32 to vector<16x32xf32>
      %c0_11 = arith.constant 0 : index
      %c0_12 = arith.constant 0 : index
      %13 = vector.load %arg7[%c0_11, %c0_12] : memref<16x32xf32, #tpu.memory_space<vmem>>, vector<16x32xf32>
      tpu.vector_store %arg7[%c0_11, %c0_12], %12 {strides = array<i32>} : memref<16x32xf32, #tpu.memory_space<vmem>>, vector<16x32xf32>,
    } else {
    }
    %c0 = arith.constant 0 : index
    %c0_1 = arith.constant 0 : index
    %3 = vector.load %arg7[%c0, %c0_1] : memref<16x32xf32, #tpu.memory_space<vmem>>, vector<16x32xf32>
    %c0_2 = arith.constant 0 : index
    %c0_3 = arith.constant 0 : index
    %4 = vector.load %arg3[%c0_2, %c0_3] : memref<16x32xf32, #tpu.memory_space<vmem>>, vector<16x32xf32>
    %c0_4 = arith.constant 0 : index
    %c0_5 = arith.constant 0 : index
    %5 = vector.load %arg4[%c0_4, %c0_5] : memref<32x32xf32, #tpu.memory_space<vmem>>, vector<32x32xf32>
    %cst = arith.constant dense<0.000000e+00> : vector<16x32xf32>
    %6 = tpu.matmul %4, %5, %cst {dimension_numbers = #tpu.dot_dimension_numbers<[1], [0], [0], [1], [0, 0, 1, 1], [], []>} : vector<16x32xf32>, vector<32x32xf32>, vector<16x32xf32> -> vector<16x32xf32>
    %7 = arith.addf %3, %6 : vector<16x32xf32>
    %c0_6 = arith.constant 0 : index
    %c0_7 = arith.constant 0 : index
    %8 = vector.load %arg7[%c0_6, %c0_7] : memref<16x32xf32, #tpu.memory_space<vmem>>, vector<16x32xf32>
    tpu.vector_store %arg7[%c0_6, %c0_7], %7 {strides = array<i32>} : memref<16x32xf32, #tpu.memory_space<vmem>>, vector<16x32xf32>,
    %c0_i32_8 = arith.constant 0 : i32
    %9 = arith.cmpi eq, %arg2, %c0_i32_8 : i32
    %10 = arith.extui %9 : i1 to i32
    %c0_i32_9 = arith.constant 0 : i32
    %11 = arith.cmpi ne, %10, %c0_i32_9 : i32
    scf.if %11 {
      %c0_10 = arith.constant 0 : index
      %c0_11 = arith.constant 0 : index
      %12 = vector.load %arg7[%c0_10, %c0_11] : memref<16x32xf32, #tpu.memory_space<vmem>>, vector<16x32xf32>
      %c0_12 = arith.constant 0 : index
      %c0_13 = arith.constant 0 : index
      %13 = vector.load %arg5[%c0_12, %c0_13] : memref<1x32xf32, #tpu.memory_space<vmem>>, vector<1x32xf32>
      %14 = vector.broadcast %13 : vector<1x32xf32> to vector<16x32xf32>
      %15 = arith.addf %12, %14 : vector<16x32xf32>
      %c0_14 = arith.constant 0 : index
      %c0_15 = arith.constant 0 : index
      %16 = vector.load %arg6[%c0_14, %c0_15] : memref<16x32xf32, #tpu.memory_space<vmem>>, vector<16x32xf32>
      tpu.vector_store %arg6[%c0_14, %c0_15], %15 {strides = array<i32>} : memref<16x32xf32, #tpu.memory_space<vmem>>, vector<16x32xf32>,
    } else {
    }
    return
  }
  func.func @transform_0(%arg0: i32, %arg1: i32, %arg2: i32) -> (i32, i32) {
    %c0_i32 = arith.constant 0 : i32
    return %arg0, %arg2 : i32, i32
  }
  func.func @transform_1(%arg0: i32, %arg1: i32, %arg2: i32) -> (i32, i32) {
    %c0_i32 = arith.constant 0 : i32
    return %arg2, %arg1 : i32, i32
  }
  func.func @transform_2(%arg0: i32, %arg1: i32, %arg2: i32) -> (i32, i32) {
    %c0_i32 = arith.constant 0 : i32
    %c0_i32_0 = arith.constant 0 : i32
    return %c0_i32, %arg1 : i32, i32
  }
  func.func @transform_3(%arg0: i32, %arg1: i32, %arg2: i32) -> (i32, i32) {
    %c0_i32 = arith.constant 0 : i32
    return %arg0, %arg1 : i32, i32
  }
}

</mosaic_0001>

<bundles_post_ra>
// kernel: tpu_custom_call.1
= control target key start
LH: loop header
LB: loop body
LE: loop exit
PB: predicated region body
PF: predicated region fallthrough
CT: control target
= control target key end

     0   :  { %8 = vsyncpa [#allocation4], 0  ;;  %s325_s0 = inlined_call_operand.hbm [shape: f32[16,32], index: 0, kind: input, shape index: {}]   ;;  %s326_s1 = inlined_call_operand.hbm [shape: f32[32,32], index: 1, kind: input, shape index: {}]   ;;  %s327_s2 = inlined_call_operand.vmem [shape: f32[1,32], index: 2, kind: input, shape index: {}]   ;;  %s328_s3 = inlined_call_operand.hbm [shape: f32[16,32], index: 3, kind: output, shape index: {}]  }
   0x1   :  { %9 = vsyncpa [#allocation7], 0 }
   0x2   :  { %10 = vsyncpa [#allocation5], 0  ;;  %s270_s12 = smov [#allocation3]  }
   0x3   :  { %s16_s13 = sshll.u32 %s270_s12, 4  ;;  %s17_s13 = int_to_ptr.vmem [resolvable:$true] %s16_s13 }
   0x4   :  { %s212_s14 = scalar_lea.vmem %s17_s13, 256  ;;  %p217_p1 = scmp.lt.s32.totalorder %s17_s13, %s17_s13 }
   0x5   :  { %p213_p0 = scmp.ne.s32.totalorder %s17_s13, %s212_s14  ;;  %p218_p2 = scmp.lt.s32.totalorder %s212_s14, %s212_s14 }
   0x7   :  { %p219_p3 = por %p218_p2, %p217_p1 }
   0x9   :  { %p220_p4 = pnand %p219_p3, %p213_p0 }
   0xb   :  { %223 = shalt.err (!%p220_p4)
}
   0xc   :  { %s271_s15 = smov 128   ;;  %s272_s16 = smov 8  }
   0xd   :  { %22 = dma.hbm_to_vmem [thread:$0]  %s325_s0, 256, %s17_s13, [#allocation4], %s271_s15, %s271_s15, %s272_s16  }
   0xe   :  { %s273_s19 = smov [#allocation6]  }
   0xf   :  { %s28_s20 = sshll.u32 %s273_s19, 4  ;;  %s29_s20 = int_to_ptr.vmem [resolvable:$true] %s28_s20 }
  0x10   :  { %s232_s21 = scalar_lea.vmem %s29_s20, 512  ;;  %p237_p6 = scmp.lt.s32.totalorder %s29_s20, %s29_s20 }
  0x11   :  { %p233_p5 = scmp.ne.s32.totalorder %s29_s20, %s232_s21  ;;  %p238_p7 = scmp.lt.s32.totalorder %s232_s21, %s232_s21 }
  0x13   :  { %p239_p8 = por %p238_p7, %p237_p6 }
  0x15   :  { %p240_p9 = pnand %p239_p8, %p233_p5 }
  0x17   :  { %243 = shalt.err (!%p240_p9)
}
  0x18   :  { %34 = dma.hbm_to_vmem [thread:$0]  %s326_s1, 512, %s29_s20, [#allocation7], %s271_s15, %s271_s15, %s272_s16  }
  0x19   :  { %264 = dma.done.wait [#allocation4], 256  }
  0x1a   :  { %265 = vsyncadd [#allocation4], 4294967040 }
  0x1b   :  { %266 = dma.done.wait [#allocation7], 512  }
  0x1c   :  { %267 = vsyncadd [#allocation7], 4294966784  ;;  %vm47_vm0 = vcmask 261120   ;;  %v274_v0 = vmov 0.0   ;;  %v57_v1 = vld [vmem:[#allocation6 + $0x18] sm:$0xff]  ;;  %v56_v2 = vld [vmem:[#allocation6 + $0x10] sm:$0xff] }
  0x1d   :  { %49 = vst.msk [vmem:[#allocation2 + $0x8] sm:$0xff] %vm47_vm0, %v274_v0  ;;  %48 = vst.msk [vmem:[#allocation2] sm:$0xff] %vm47_vm0, %v274_v0  ;;  %187 = vmatprep.subr.mxu0 %v57_v1  ;;  %v52_v3 = vld [vmem:[#allocation3] sm:$0xff]  ;;  %v55_v4 = vld [vmem:[#allocation6 + $0x8] sm:$0xff]  ;;  %s275_s24 = smov [#allocation8]  }
  0x1e   :  { %188 = vmatpush3.msra.mxu0 %v57_v1  ;;  %195 = vmatprep.mubr.msk.f32.mxu0 %vm47_vm0, %v52_v3  ;;  %v54_v5 = vld [vmem:[#allocation6] sm:$0xff]  ;;  %v53_v6 = vld [vmem:[#allocation3 + $0x8] sm:$0xff]  ;;  %s165_s25 = sshll.u32 %s275_s24, 4  ;;  %s166_s25 = int_to_ptr.vmem [resolvable:$true] %s165_s25 }
  0x1f   :  { %189 = vmatprep.subr.mxu0 %v56_v2  ;;  %v180_v13 = vld [vmem:[%s327_s2] ss:$0 sm:$0xff]  ;;  %s244_s26 = scalar_lea.vmem %s166_s25, 256  ;;  %p249_p11 = scmp.lt.s32.totalorder %s166_s25, %s166_s25 }
  0x20   :  { %190 = vmatpush3.msra.mxu0 %v56_v2  ;;  %p245_p10 = scmp.ne.s32.totalorder %s166_s25, %s244_s26  ;;  %p250_p12 = scmp.lt.s32.totalorder %s244_s26, %s244_s26 }
  0x21   :  { %191 = vmatprep.subr.mxu0 %v55_v4 }
  0x22   :  { %192 = vmatpush3.msra.mxu0 %v55_v4  ;;  %p251_p13 = por %p250_p12, %p249_p11 }
  0x23   :  { %193 = vmatprep.subr.mxu0 %v54_v5 }
  0x24   :  { %194 = vmatpush3.msra.mxu0 %v54_v5  ;;  %v51_v7 = vld [vmem:[#allocation2 + $0x8] sm:$0xff]  ;;  %v50_v9 = vld [vmem:[#allocation2] sm:$0xff]  ;;  %p252_p0 = pnand %p251_p13, %p245_p10 }
  0x25   :  { %196 = vmatmul.mubr.msk.f32.vlgmr.msra.gmra.mxu0 %vm47_vm0, %v53_v6 }
  0xe5   :  { %v197_v8 = vpop.f32.mrf.mxu0 }
  0xe6   :  { %v141_v10 = vadd.f32 %v197_v8, %v51_v7 }
  0xe7   :  { %v131_v11 = vpop.f32.mrf.mxu0 }
  0xe8   :  { %143 = vst.msk [vmem:[#allocation2 + $0x8] sm:$0xff] %vm47_vm0, %v141_v10  ;;  %v140_v12 = vadd.f32 %v131_v11, %v50_v9 }
  0xea   :  { %142 = vst.msk [vmem:[#allocation2] sm:$0xff] %vm47_vm0, %v140_v12 }
  0xef   :  { %v148_v14 = vld [vmem:[#allocation2 + $0x8] sm:$0xff] }
  0xf0   :  { %v157_v15 = vadd.f32 %v180_v13, %v148_v14 }
  0xf1   :  { %v147_v16 = vld [vmem:[#allocation2] sm:$0xff] }
  0xf2   :  { %v156_v17 = vadd.f32 %v180_v13, %v147_v16  ;;  %159 = vst.msk [vmem:[#allocation8 + $0x8] sm:$0xff] %vm47_vm0, %v157_v15 }
  0xf4   :  { %158 = vst.msk [vmem:[#allocation8] sm:$0xff] %vm47_vm0, %v156_v17 }
  0xf5   :  { %255 = shalt.err (!%p252_p0)
}
  0xf6   :  { %171 = dma.vmem_to_hbm [thread:$0]  %s166_s25, 256, %s328_s3, [#allocation5], %s271_s15, %s271_s15, %s272_s16  }
  0xf7   :  { %268 = dma.done.wait [#allocation5], 256  }
  0xf8   :  { %269 = vsyncadd [#allocation5], 4294967040 }
  0xf9   :  { %175 = vsyncpa [#allocation4], 1 }
  0xfa   :  { %176 = vsyncpa [#allocation7], 1 }
  0xfb   :  { %177 = vsyncpa [#allocation5], 1 }

</bundles_post_ra>
